<compile_context>
chip_gen: v7x
topology: tpu7x:2x2x1
jax: 0.10.0
libtpu: 0.0.40
codegen_flags: <defaults>
</compile_context>

<pallas_src>
import jax
import jax.numpy as jnp
from jax import lax
from jax.experimental import pallas as pl
from jax.experimental.pallas import tpu as pltpu

H = W = 28          # fixed by nn.LayerNorm((output_ch, 28, 28))
LN_EPS = 1e-5       # PyTorch LayerNorm default


def _memory_conv_ln_kernel(p_ref, w_ref, c_ref, ln_ref, o_ref):
    """Per-sample body.

    p_ref : (1, Cin*K*K+1, P)  im2col patches + ones row (bias column)
    w_ref : (4*Cout, Cin*K*K+1) fused [Wz;Wi;Wf;Wo] with biases in last column
    c_ref : (1, Cout, P)        cell state (channel-major, spatial on lanes)
    ln_ref: (2, Cout, P)        packed [gamma; beta]
    o_ref : (1, Cout, P)        output
    """
    Cout = o_ref.shape[1]

    # Single fused MXU matmul for all four gates (biases come from the ones-row).
    g = jnp.dot(w_ref[...], p_ref[0], preferred_element_type=jnp.float32)  # (4*Cout, P)

    z = jnp.tanh(g[:Cout])
    i = jax.nn.sigmoid(g[Cout:2 * Cout])
    f = jax.nn.sigmoid(g[2 * Cout:3 * Cout])
    o = jax.nn.sigmoid(g[3 * Cout:])

    c_new = i * z + f * c_ref[0]                 # cell update
    t = o * jnp.tanh(c_new)                      # (Cout, P)

    # LayerNorm over all (C, H, W) elements of this sample (biased variance),
    # one-pass statistics: sum and sum-of-squares.
    n = t.shape[0] * t.shape[1]
    s = jnp.sum(t)
    ss = jnp.sum(t * t)
    mean = s / n
    var = ss / n - mean * mean
    t_hat = (t - mean) * lax.rsqrt(var + LN_EPS)

    o_ref[0] = (t_hat * ln_ref[0] + ln_ref[1]).astype(o_ref.dtype)


def memory_conv2d_layernorm(x, c, params):
    """x: (N, Cin, 28, 28), c: (N, Cout, 28, 28)  -> (N, Cout, 28, 28)"""
    N, Cin, Hx, Wx = x.shape
    Cout, _, K, _ = params["wz"].shape
    pad = K // 2
    P, KC = Hx * Wx, Cin * K * K

    # --- glue: channel-major im2col (pad + K*K shifted slices, no transposes) ---
    xp = jnp.pad(x, ((0, 0), (0, 0), (pad, pad), (pad, pad)))
    patches = jnp.stack([xp[:, :, dy:dy + Hx, dx:dx + Wx]
                         for dy in range(K) for dx in range(K)],
                        axis=2).reshape(N, KC, P)            # flat idx = ci*K*K + dy*K + dx
    patches = jnp.concatenate(
        [patches, jnp.ones((N, 1, P), patches.dtype)], axis=1)   # ones row -> bias column

    def wrow(w, b):      # (Cout,Cin,K,K),(Cout,) -> (Cout, KC+1) with bias folded in
        return jnp.concatenate([w.reshape(Cout, KC), b[:, None]], axis=1)

    wcat = jnp.concatenate([wrow(params["wz"], params["bz"]),
                            wrow(params["wi"], params["bi"]),
                            wrow(params["wf"], params["bf"]),
                            wrow(params["wo"], params["bo"])], axis=0)   # (4*Cout, KC+1)

    c_flat = c.reshape(N, Cout, P)
    ln = jnp.stack([params["ln_w"].reshape(Cout, P),
                    params["ln_b"].reshape(Cout, P)])                     # (2, Cout, P)

    out = pl.pallas_call(
        _memory_conv_ln_kernel,
        out_shape=jax.ShapeDtypeStruct((N, Cout, P), jnp.float32),
        grid=(N,),
        in_specs=[
            pl.BlockSpec((1, KC + 1, P), lambda b: (b, 0, 0)),    # patches (per sample)
            pl.BlockSpec((4 * Cout, KC + 1), lambda b: (0, 0)),   # fused gate weights+bias
            pl.BlockSpec((1, Cout, P), lambda b: (b, 0, 0)),      # cell state (per sample)
            pl.BlockSpec((2, Cout, P), lambda b: (0, 0, 0)),      # packed gamma/beta
        ],
        out_specs=pl.BlockSpec((1, Cout, P), lambda b: (b, 0, 0)),
        compiler_params=pltpu.CompilerParams(dimension_semantics=("parallel",)),
    )(patches, wcat, c_flat, ln)

    return out.reshape(N, Cout, Hx, Wx)


def reference(x, c, params):
    """Pure-JAX reference mirroring the PyTorch forward."""
    def conv(w, b):
        y = lax.conv_general_dilated(x, w, window_strides=(1, 1), padding="SAME",
                                     dimension_numbers=("NCHW", "OIHW", "NCHW"))
        return y + b[None, :, None, None]
    z = jnp.tanh(conv(params["wz"], params["bz"]))
    i = jax.nn.sigmoid(conv(params["wi"], params["bi"]))
    f = jax.nn.sigmoid(conv(params["wf"], params["bf"]))
    o = jax.nn.sigmoid(conv(params["wo"], params["bo"]))
    cn = i * z + f * c
    t = o * jnp.tanh(cn)
    mean = t.mean(axis=(1, 2, 3), keepdims=True)
    var = t.var(axis=(1, 2, 3), keepdims=True)   # biased, like nn.LayerNorm
    t = (t - mean) / jnp.sqrt(var + LN_EPS)
    return t * params["ln_w"][None] + params["ln_b"][None]


if __name__ == "__main__":
    N, Cin, Cout, K = 2, 4, 8, 3
    key = jax.random.PRNGKey(0)
    keys = jax.random.split(key, 12)

    scale = 1.0 / (Cin * K * K) ** 0.5
    params = {
        "wz": jax.random.normal(keys[0], (Cout, Cin, K, K), jnp.float32) * scale,
        "wi": jax.random.normal(keys[1], (Cout, Cin, K, K), jnp.float32) * scale,
        "wf": jax.random.normal(keys[2], (Cout, Cin, K, K), jnp.float32) * scale,
        "wo": jax.random.normal(keys[3], (Cout, Cin, K, K), jnp.float32) * scale,
        "bz": jax.random.normal(keys[4], (Cout,), jnp.float32) * scale,
        "bi": jax.random.normal(keys[5], (Cout,), jnp.float32) * scale,
        "bf": jax.random.normal(keys[6], (Cout,), jnp.float32) * scale,
        "bo": jax.random.normal(keys[7], (Cout,), jnp.float32) * scale,
        "ln_w": 1.0 + 0.1 * jax.random.normal(keys[8], (Cout, H, W), jnp.float32),
        "ln_b": 0.1 * jax.random.normal(keys[9], (Cout, H, W), jnp.float32),
    }

    x = jax.random.normal(keys[10], (N, Cin, H, W), jnp.float32)
    # self.c after reset(): zeros with the conv-output shape
    c = jnp.zeros((N, Cout, H, W), jnp.float32)

    out = memory_conv2d_layernorm(x, c, params)
    out = jax.block_until_ready(out)

    ref = reference(x, c, params)
    assert out.shape == (N, Cout, H, W)
    assert jnp.allclose(out, ref, atol=1e-3, rtol=1e-3), (
        f"max abs err {jnp.max(jnp.abs(out - ref))}")

    print("KERNEL_OK")
</pallas_src>

<mosaic_0001>
module attributes {stable_mosaic.version = 11 : i64} {
  func.func @_memory_conv_ln_kernel(%arg0: i32, %arg1: memref<1x37x784xf32, #tpu.memory_space<vmem>>, %arg2: memref<32x37xf32, #tpu.memory_space<vmem>>, %arg3: memref<1x8x784xf32, #tpu.memory_space<vmem>>, %arg4: memref<2x8x784xf32, #tpu.memory_space<vmem>>, %arg5: memref<1x8x784xf32, #tpu.memory_space<vmem>>) attributes {dimension_semantics = [#tpu.dimension_semantics<parallel>], iteration_bounds = array<i64: 2>, scalar_prefetch = 0 : i64, scratch_operands = 0 : i64, tpu.core_type = #tpu.core_type<tc>, window_params = [{transform_indices = @transform_0, window_bounds = array<i64: 1, 37, 784>}, {pipeline_mode = #tpu.pipeline_mode<synchronous>, transform_indices = @transform_1, window_bounds = array<i64: 32, 37>}, {transform_indices = @transform_2, window_bounds = array<i64: 1, 8, 784>}, {pipeline_mode = #tpu.pipeline_mode<synchronous>, transform_indices = @transform_3, window_bounds = array<i64: 2, 8, 784>}, {transform_indices = @transform_4, window_bounds = array<i64: 1, 8, 784>}]} {
    %c0 = arith.constant 0 : index
    %c0_0 = arith.constant 0 : index
    %0 = vector.load %arg2[%c0, %c0_0] : memref<32x37xf32, #tpu.memory_space<vmem>>, vector<32x37xf32>
    %c0_1 = arith.constant 0 : index
    %c0_2 = arith.constant 0 : index
    %c0_3 = arith.constant 0 : index
    %1 = vector.load %arg1[%c0_1, %c0_2, %c0_3] : memref<1x37x784xf32, #tpu.memory_space<vmem>>, vector<1x37x784xf32>
    %2 = vector.shape_cast %1 : vector<1x37x784xf32> to vector<37x784xf32>
    %cst = arith.constant dense<0.000000e+00> : vector<32x784xf32>
    %3 = tpu.matmul %0, %2, %cst {dimension_numbers = #tpu.dot_dimension_numbers<[1], [0], [0], [1], [0, 0, 1, 1], [], []>} : vector<32x37xf32>, vector<37x784xf32>, vector<32x784xf32> -> vector<32x784xf32>
    %4 = vector.extract_strided_slice %3 {offsets = [0, 0], sizes = [8, 784], strides = [1, 1]} : vector<32x784xf32> to vector<8x784xf32>
    %5 = math.tanh %4 : vector<8x784xf32>
    %6 = vector.extract_strided_slice %3 {offsets = [8, 0], sizes = [8, 784], strides = [1, 1]} : vector<32x784xf32> to vector<8x784xf32>
    %7 = arith.negf %6 : vector<8x784xf32>
    %8 = math.exp %7 : vector<8x784xf32>
    %cst_4 = arith.constant 1.000000e+00 : f32
    %9 = vector.broadcast %cst_4 : f32 to vector<8x784xf32>
    %10 = arith.addf %9, %8 : vector<8x784xf32>
    %11 = arith.divf %9, %10 : vector<8x784xf32>
    %12 = vector.extract_strided_slice %3 {offsets = [16, 0], sizes = [8, 784], strides = [1, 1]} : vector<32x784xf32> to vector<8x784xf32>
    %13 = arith.negf %12 : vector<8x784xf32>
    %14 = math.exp %13 : vector<8x784xf32>
    %cst_5 = arith.constant 1.000000e+00 : f32
    %15 = vector.broadcast %cst_5 : f32 to vector<8x784xf32>
    %16 = arith.addf %15, %14 : vector<8x784xf32>
    %17 = arith.divf %15, %16 : vector<8x784xf32>
    %18 = vector.extract_strided_slice %3 {offsets = [24, 0], sizes = [8, 784], strides = [1, 1]} : vector<32x784xf32> to vector<8x784xf32>
    %19 = arith.negf %18 : vector<8x784xf32>
    %20 = math.exp %19 : vector<8x784xf32>
    %cst_6 = arith.constant 1.000000e+00 : f32
    %21 = vector.broadcast %cst_6 : f32 to vector<8x784xf32>
    %22 = arith.addf %21, %20 : vector<8x784xf32>
    %23 = arith.divf %21, %22 : vector<8x784xf32>
    %24 = arith.mulf %11, %5 : vector<8x784xf32>
    %c0_7 = arith.constant 0 : index
    %c0_8 = arith.constant 0 : index
    %c0_9 = arith.constant 0 : index
    %25 = vector.load %arg3[%c0_7, %c0_8, %c0_9] : memref<1x8x784xf32, #tpu.memory_space<vmem>>, vector<1x8x784xf32>
    %26 = vector.shape_cast %25 : vector<1x8x784xf32> to vector<8x784xf32>
    %27 = arith.mulf %17, %26 : vector<8x784xf32>
    %28 = arith.addf %24, %27 : vector<8x784xf32>
    %29 = math.tanh %28 : vector<8x784xf32>
    %30 = arith.mulf %23, %29 : vector<8x784xf32>
    %31 = vector.shape_cast %30 : vector<8x784xf32> to vector<1x8x784xf32>
    %cst_10 = arith.constant dense<0.000000e+00> : vector<1xf32>
    %32 = vector.multi_reduction <add>, %31, %cst_10 [1, 2] : vector<1x8x784xf32> to vector<1xf32>
    %33 = vector.shape_cast %32 : vector<1xf32> to vector<1x1x1xf32>
    %34 = vector.extract %33[0, 0, 0] : f32 from vector<1x1x1xf32>
    %35 = arith.mulf %30, %30 : vector<8x784xf32>
    %36 = vector.shape_cast %35 : vector<8x784xf32> to vector<1x8x784xf32>
    %cst_11 = arith.constant dense<0.000000e+00> : vector<1xf32>
    %37 = vector.multi_reduction <add>, %36, %cst_11 [1, 2] : vector<1x8x784xf32> to vector<1xf32>
    %38 = vector.shape_cast %37 : vector<1xf32> to vector<1x1x1xf32>
    %39 = vector.extract %38[0, 0, 0] : f32 from vector<1x1x1xf32>
    %cst_12 = arith.constant 6.272000e+03 : f32
    %40 = arith.divf %34, %cst_12 : f32
    %cst_13 = arith.constant 6.272000e+03 : f32
    %41 = arith.divf %39, %cst_13 : f32
    %42 = arith.mulf %40, %40 : f32
    %43 = arith.subf %41, %42 : f32
    %44 = vector.broadcast %40 : f32 to vector<8x784xf32>
    %45 = arith.subf %30, %44 : vector<8x784xf32>
    %cst_14 = arith.constant 9.99999974E-6 : f32
    %46 = arith.addf %43, %cst_14 : f32
    %47 = math.rsqrt %46 : f32
    %48 = vector.broadcast %47 : f32 to vector<8x784xf32>
    %49 = arith.mulf %45, %48 : vector<8x784xf32>
    %c0_15 = arith.constant 0 : index
    %c0_16 = arith.constant 0 : index
    %c0_17 = arith.constant 0 : index
    %50 = vector.load %arg4[%c0_15, %c0_16, %c0_17] : memref<2x8x784xf32, #tpu.memory_space<vmem>>, vector<1x8x784xf32>
    %51 = vector.shape_cast %50 : vector<1x8x784xf32> to vector<8x784xf32>
    %52 = arith.mulf %49, %51 : vector<8x784xf32>
    %c1 = arith.constant 1 : index
    %c0_18 = arith.constant 0 : index
    %c0_19 = arith.constant 0 : index
    %53 = vector.load %arg4[%c1, %c0_18, %c0_19] : memref<2x8x784xf32, #tpu.memory_space<vmem>>, vector<1x8x784xf32>
    %54 = vector.shape_cast %53 : vector<1x8x784xf32> to vector<8x784xf32>
    %55 = arith.addf %52, %54 : vector<8x784xf32>
    %c0_20 = arith.constant 0 : index
    %c0_21 = arith.constant 0 : index
    %c0_22 = arith.constant 0 : index
    %56 = vector.load %arg5[%c0_20, %c0_21, %c0_22] : memref<1x8x784xf32, #tpu.memory_space<vmem>>, vector<1x8x784xf32>
    %57 = vector.shape_cast %56 : vector<1x8x784xf32> to vector<8x784xf32>
    %58 = vector.shape_cast %55 : vector<8x784xf32> to vector<1x8x784xf32>
    tpu.vector_store %arg5[%c0_20, %c0_21, %c0_22], %58 {strides = array<i32>} : memref<1x8x784xf32, #tpu.memory_space<vmem>>, vector<1x8x784xf32>,
    return
  }
  func.func @transform_0(%arg0: i32) -> (i32, i32, i32) {
    %c0_i32 = arith.constant 0 : i32
    %c0_i32_0 = arith.constant 0 : i32
    %c0_i32_1 = arith.constant 0 : i32
    return %arg0, %c0_i32, %c0_i32_0 : i32, i32, i32
  }
  func.func @transform_1(%arg0: i32) -> (i32, i32) {
    %c0_i32 = arith.constant 0 : i32
    %c0_i32_0 = arith.constant 0 : i32
    %c0_i32_1 = arith.constant 0 : i32
    return %c0_i32, %c0_i32_0 : i32, i32
  }
  func.func @transform_2(%arg0: i32) -> (i32, i32, i32) {
    %c0_i32 = arith.constant 0 : i32
    %c0_i32_0 = arith.constant 0 : i32
    %c0_i32_1 = arith.constant 0 : i32
    return %arg0, %c0_i32, %c0_i32_0 : i32, i32, i32
  }
  func.func @transform_3(%arg0: i32) -> (i32, i32, i32) {
    %c0_i32 = arith.constant 0 : i32
    %c0_i32_0 = arith.constant 0 : i32
    %c0_i32_1 = arith.constant 0 : i32
    %c0_i32_2 = arith.constant 0 : i32
    return %c0_i32, %c0_i32_0, %c0_i32_1 : i32, i32, i32
  }
  func.func @transform_4(%arg0: i32) -> (i32, i32, i32) {
    %c0_i32 = arith.constant 0 : i32
    %c0_i32_0 = arith.constant 0 : i32
    %c0_i32_1 = arith.constant 0 : i32
    return %arg0, %c0_i32, %c0_i32_0 : i32, i32, i32
  }
}

</mosaic_0001>

<bundles_post_ra>
// kernel: tpu_custom_call.1
= control target key start
LH: loop header
LB: loop body
LE: loop exit
PB: predicated region body
PF: predicated region fallthrough
CT: control target
= control target key end

     0   :  { %9 = vsyncpa [#allocation3], 0  ;;  %s1698_s0 = inlined_call_operand.vmem [shape: f32[2,37,784], index: 0, kind: input, shape index: {}]   ;;  %s1699_s1 = inlined_call_operand.vmem [shape: f32[32,37], index: 1, kind: input, shape index: {}]   ;;  %s1700_s2 = inlined_call_operand.vmem [shape: f32[2,8,784], index: 2, kind: input, shape index: {}]   ;;  %s1701_s3 = inlined_call_operand.vmem [shape: f32[2,8,784], index: 3, kind: input, shape index: {}]   ;;  %s1702_s4 = inlined_call_operand.hbm [shape: f32[2,8,784], index: 4, kind: output, shape index: {}]  }
   0x1   :  { %11 = vsyncpa [#allocation3 + $0x1], 0  ;;  %s1379_s15 = smov 0   ;;  %s1381_s16 = smov 0  }
   0x2   :  { %s1383_s17 = smov 0   ;;  %s1385_s18 = smov 0  }
   0x3 LB: > { %s1400_s19 = sadd.s32 4294967295, %s1350_s18   ;;  %s1007_s20 = sadd.s32 4294967294, %s1350_s18   ;;  %s1350_s18 = sphi %s1385_s18, %s1708_s18   ;;  %s1346_s17 = sphi %s1383_s17, %s1707_s17   ;;  %s1342_s16 = sphi %s1381_s16, %s1706_s16   ;;  %s1338_s15 = sphi %s1379_s15, %s1705_s15  }
   0x4   : > { %s1404_s21 = sadd.s32 1, %s1350_s18   ;;  %s118_s22 = sadd.s32 1, %s1346_s17 }
   0x5   : > { %s115_s23 = ssub.s32 %s1350_s18, %s1404_s21  ;;  %p128_p0 = scmp.ne.s32.totalorder %s1346_s17, %s1342_s16 }
   0x6   : > { %p116_p1 = scmp.eq.s32.totalorder %s115_s23, 0  ;;  %p129_p2 = scmp.eq.s32.totalorder %s1400_s19, 1 }
   0x7   : > { %p134_p3 = scmp.ne.s32.totalorder %s1342_s16, %s1338_s15  ;;  %p135_p4 = scmp.eq.s32.totalorder %s1007_s20, 1 }
   0x8   : > { %s1415_s24 = scalar_select %p116_p1, %s1346_s17, %s118_s22  }
   0x9   : > { %p1417_p5 = por %p129_p2, %p128_p0  ;;  %p1421_p6 = por %p135_p4, %p134_p3 }
   0xa   : > { %p1010_p7 = scmp.ge.s32.totalorder %s1350_s18, 1  ;;  %p175_p8 = scmp.lt.s32.totalorder %s1350_s18, 3 }
   0xc   : > { %p176_p9 = pnand %p1010_p7, %p175_p8 }
   0xd   : > { %p206_p10 = scmp.lt.s32.totalorder (!%p176_p9), %s1400_s19, 1  ;;  %v1352_v0 = vmov (!%p176_p9), 0.0   ;;  %vm268_vm0 = vcmask (!%p176_p9), 1044480   ;;  %v216_v29 = vld [vmem:[%s1699_s1] sm:$0xff] (!%p176_p9)  ;;  %vm255_vm1 = vcmask (!%p176_p9), 302080   ;;  %v217_v44 = vld [vmem:[%s1699_s1 + $0x8] sm:$0xff] (!%p176_p9) }
   0xe   : > { %179 = sbr.rel (%p176_p9) target bundleno = 640 (0x280), region = 36  ;;  %354 = vmatprep.mubr.f32.mxu0 (!%p176_p9), %v1352_v0  ;;  %443 = vmatprep.mubr.f32.mxu1 (!%p176_p9), %v1352_v0  ;;  %v218_v50 = vld [vmem:[%s1699_s1 + $0x10] sm:$0xff] (!%p176_p9)  ;;  %v219_v52 = vld [vmem:[%s1699_s1 + $0x18] sm:$0xff] (!%p176_p9)  ;;  %vm822_vm2 = vcmask (!%p176_p9), 130048   ;;  %s203_s8 = sand.u32 (!%p176_p9), 1, %s1342_s16  }
   0xf   : > { %s1597_s9 = smul.u32 (!%p176_p9), 56, %s203_s8  ;;  %s1353_s20 = smov (!%p176_p9), [#allocation2]  }
  0x10   : > { %s1292_s22 = sshll.u32 (!%p176_p9), %s1353_s20, 4  ;;  %s1293_s22 = int_to_ptr.vmem [resolvable:$false] %s1292_s22 }
  0x15   : > { %s1431_s27 = scalar_select %p206_p10, %s1400_s19, 1 }
  0x17   : > { %s1125_s28 = smul.u32 280, %s1431_s27 }
  0x18   : > { %s1126_s14 = smul.u32 56, %s1431_s27 }
  0x19   : > { %s1437_s5 = scalar_lea.vmem %s1698_s0, %s1125_s28 }
  0x1a   : > { %v221_v1 = vld [vmem:[%s1437_s5 + $0x8] sm:$0xff]  ;;  %v228_v2 = vld [vmem:[%s1437_s5 + $0x40] sm:$0xff]  ;;  %v223_v3 = vld [vmem:[%s1437_s5 + $0x18] sm:$0xff]  ;;  %s1538_s23 = scalar_lea.vmem %s1700_s2, %s1126_s14 }
  0x1b   : > { %v1092_v4 = vpack.c.bf16 %v228_v2, %v221_v1  ;;  %v230_v5 = vld [vmem:[%s1437_s5 + $0x50] sm:$0xff]  ;;  %v220_v6 = vld [vmem:[%s1437_s5] sm:$0xff]  ;;  %v227_v7 = vld [vmem:[%s1437_s5 + $0x38] sm:$0xff] }
  0x1c   : > { %v1100_v8 = vpack.c.bf16 %v230_v5, %v223_v3  ;;  %v1094_v9 = vpack.c.bf16 %v227_v7, %v220_v6  ;;  %v222_v10 = vld [vmem:[%s1437_s5 + $0x10] sm:$0xff]  ;;  %v229_v11 = vld [vmem:[%s1437_s5 + $0x48] sm:$0xff]  ;;  %v235_v12 = vld [vmem:[%s1437_s5 + $0x78] sm:$0xff] }
  0x1d   : > { %1093 = vmatprep.subr.bf16.mxu0 %v1092_v4  ;;  %v1102_v13 = vpack.c.bf16 %v229_v11, %v222_v10  ;;  %v242_v14 = vld [vmem:[%s1437_s5 + $0xb0] sm:$0xff]  ;;  %v237_v15 = vld [vmem:[%s1437_s5 + $0x88] sm:$0xff]  ;;  %v244_v16 = vld [vmem:[%s1437_s5 + $0xc0] sm:$0xff] }
  0x1e   : > { %1101 = vmatprep.subr.bf16.mxu1 %v1100_v8  ;;  %1095 = vmatpush1.bf16.msra.mxu0 %v1094_v9  ;;  %v1096_v17 = vpack.c.bf16 %v242_v14, %v235_v12  ;;  %v1104_v18 = vpack.c.bf16 %v244_v16, %v237_v15  ;;  %v234_v19 = vld [vmem:[%s1437_s5 + $0x70] sm:$0xff]  ;;  %v241_v20 = vld [vmem:[%s1437_s5 + $0xa8] sm:$0xff]  ;;  %v236_v21 = vld [vmem:[%s1437_s5 + $0x80] sm:$0xff] }
  0x1f   : > { %1103 = vmatpush1.bf16.msra.mxu1 %v1102_v13  ;;  %v1098_v22 = vpack.c.bf16 %v241_v20, %v234_v19  ;;  %v243_v23 = vld [vmem:[%s1437_s5 + $0xb8] sm:$0xff]  ;;  %v249_v25 = vld [vmem:[%s1437_s5 + $0xe8] sm:$0x1f]  ;;  %v232_v28 = vld [vmem:[%s1437_s5 + $0x60] sm:$0xff] }
  0x20   : > { %1097 = vmatprep.subr.bf16.mxu0 %v1096_v17  ;;  %1105 = vmatprep.subr.bf16.mxu1 %v1104_v18  ;;  %v1106_v24 = vpack.c.bf16 %v243_v23, %v236_v21  ;;  %v251_v26 = vld [vmem:[%s1437_s5 + $0xf8] sm:$0x1f]  ;;  %v225_v27 = vld [vmem:[%s1437_s5 + $0x28] sm:$0xff]  ;;  %v224_v30 = vld [vmem:[%s1437_s5 + $0x20] sm:$0xff] }
  0x21   : > { %v231_v31 = vld [vmem:[%s1437_s5 + $0x58] sm:$0xff]  ;;  %v248_v32 = vld [vmem:[%s1437_s5 + $0xe0] sm:$0x1f]  ;;  %v246_v34 = vld [vmem:[%s1437_s5 + $0xd0] sm:$0xff]  ;;  %v1108_v36 = vpack.c.bf16 %v232_v28, %v225_v27 }
  0x22   : > { %1099 = vmatpush1.bf16.msra.mxu0 %v1098_v22  ;;  %v239_v33 = vld [vmem:[%s1437_s5 + $0x98] sm:$0xff]  ;;  %v250_v35 = vld [vmem:[%s1437_s5 + $0xf0] sm:$0x1f]  ;;  %v233_v38 = vld [vmem:[%s1437_s5 + $0x68] sm:$0xff]  ;;  %v1110_v39 = vpack.c.bf16 %v231_v31, %v224_v30 }
  0x23   : > { %1107 = vmatpush1.bf16.msra.mxu1 %v1106_v24  ;;  %1013 = vmatprep.subr.msk.mxu0 %vm268_vm0, %v249_v25  ;;  %v226_v37 = vld [vmem:[%s1437_s5 + $0x30] sm:$0xff]  ;;  %v1112_v40 = vpack.c.bf16 %v246_v34, %v239_v33  ;;  %v245_v42 = vld [vmem:[%s1437_s5 + $0xc8] sm:$0xff]  ;;  %v240_v45 = vld [vmem:[%s1437_s5 + $0xa0] sm:$0xff] }
  0x24   : > { %1019 = vmatprep.subr.msk.mxu1 %vm268_vm0, %v251_v26  ;;  %v238_v41 = vld [vmem:[%s1437_s5 + $0x90] sm:$0xff]  ;;  %v1116_v43 = vpack.c.bf16 %v233_v38, %v226_v37  ;;  %v247_v46 = vld [vmem:[%s1437_s5 + $0xd8] sm:$0xff]  ;;  %v253_v49 = vld [vmem:[%s1437_s5 + $0x108] sm:$0x1f] }
  0x25   : > { %v1114_v47 = vpack.c.bf16 %v245_v42, %v238_v41  ;;  %v1120_v48 = vpack.c.bf16 %v247_v46, %v240_v45  ;;  %v252_v51 = vld [vmem:[%s1437_s5 + $0x100] sm:$0x1f]  ;;  %v254_v53 = vld [vmem:[%s1437_s5 + $0x110] sm:$0x1f] }
  0x26   : > { %1014 = vmatpush1.msk.msra.mxu0 %vm268_vm0, %v248_v32 }
  0x27   : > { %1020 = vmatpush1.msk.msra.mxu1 %vm268_vm0, %v250_v35  ;;  %1015 = vmatmul.mubr.msk.f32.vlgmr.msra.gmra.mrb[0].mxu0 %vm255_vm1, %v216_v29 }
  0x28   : > { %1021 = vmatmul.mubr.msk.f32.vlgmr.msra.gmra.mrb[0].mxu1 %vm255_vm1, %v216_v29  ;;  %1109 = vmatprep.subr.bf16.mxu0 %v1108_v36 }
  0x29   : > { %1111 = vmatpush1.bf16.msra.mxu0 %v1110_v39  ;;  %360 = vmatprep.mubr.f32.mxu0 %v1352_v0 }
  0x2a   : > { %449 = vmatprep.mubr.f32.mxu1 %v1352_v0  ;;  %1113 = vmatprep.subr.bf16.mxu0 %v1112_v40 }
  0x2b   : > { %1016 = vmatmul.mubr.msk.f32.gmra.mrb[2].mxu0 %vm255_vm1, %v217_v44  ;;  %1117 = vmatprep.subr.bf16.mxu1 %v1116_v43 }
  0x2c   : > { %1022 = vmatmul.mubr.msk.f32.gmra.mrb[2].mxu1 %vm255_vm1, %v217_v44  ;;  %366 = vmatprep.mubr.f32.mxu0 %v1352_v0 }
  0x2d   : > { %455 = vmatprep.mubr.f32.mxu1 %v1352_v0  ;;  %1115 = vmatpush1.bf16.msra.mxu0 %v1114_v47 }
  0x2e   : > { %1119 = vmatpush3.bf16.msra.mxu1 %v1116_v43  ;;  %1025 = vmatprep.subr.msk.mxu0 %vm268_vm0, %v253_v49 }
  0x2f   : > { %1017 = vmatmul.mubr.msk.f32.gmra.mrb[4].mxu0 %vm255_vm1, %v218_v50  ;;  %1121 = vmatprep.subr.bf16.mxu1 %v1120_v48 }
  0x30   : > { %1023 = vmatmul.mubr.msk.f32.gmra.mrb[4].mxu1 %vm255_vm1, %v218_v50  ;;  %372 = vmatprep.mubr.f32.mxu0 %v1352_v0 }
  0x31   : > { %461 = vmatprep.mubr.f32.mxu1 %v1352_v0  ;;  %1026 = vmatpush1.msk.msra.mxu0 %vm268_vm0, %v252_v51 }
  0x32   : > { %1123 = vmatpush3.bf16.msra.mxu1 %v1120_v48 }
  0x33   : > { %1018 = vmatmul.mubr.msk.f32.gmra.mrb[6].mxu0 %vm255_vm1, %v219_v52  ;;  %1084 = vmatprep.subr.msk.mxu1 %vm268_vm0, %v254_v53 }
  0x34   : > { %1024 = vmatmul.mubr.msk.f32.gmra.mrb[6].mxu1 %vm255_vm1, %v219_v52  ;;  %532 = vmatprep.mubr.f32.mxu0 %v1352_v0 }
  0x35   : > { %1086 = vmatprep.mubr.msk.f32.mxu1 %vm255_vm1, %v216_v29 }
  0x36   : > { %1085 = vmatpush3.msk.msra.mxu1 %vm268_vm0, %v254_v53 }
  0x37   : > { %1027 = vmatmul.mubr.msk.f32.vlgmr.msra.gmra.mrb[8].mxu0 %vm255_vm1, %v216_v29 }
  0x38   : > { %1087 = vmatmul.mubr.msk.f32.vlgmr.msra.gmra.mrb[8].mxu1 %vm255_vm1, %v217_v44  ;;  %538 = vmatprep.mubr.f32.mxu0 %v1352_v0 }
  0x39   : > { %1089 = vmatprep.mubr.msk.f32.mxu1 %vm255_vm1, %v218_v50 }
  0x3b   : > { %1028 = vmatmul.mubr.msk.f32.gmra.mrb[10].mxu0 %vm255_vm1, %v217_v44 }
  0x3c   : > { %1090 = vmatmul.mubr.msk.f32.gmra.mrb[10].mxu1 %vm255_vm1, %v219_v52  ;;  %544 = vmatprep.mubr.f32.mxu0 %v1352_v0 }
  0x3f   : > { %1029 = vmatmul.mubr.msk.f32.gmra.mrb[12].mxu0 %vm255_vm1, %v218_v50 }
  0x40   : > { %550 = vmatprep.mubr.f32.mxu0 %v1352_v0 }
  0x43   : > { %1030 = vmatmul.mubr.msk.f32.gmra.mrb[14].mxu0 %vm255_vm1, %v219_v52 }
  0xfa   : > { %v356_v54 = vpop.f32.mrb[0].mxu0 }
  0xfb   : > { %v358_v55 = vpop.f32.mrb[1].mxu0  ;;  %v445_v56 = vpop.f32.mrb[0].mxu1  ;;  %1174 = vtanh.f32 %v356_v54 }
  0xfc   : > { %v447_v57 = vpop.f32.mrb[1].mxu1  ;;  %1176 = vtanh.f32 %v358_v55 }
  0xfd   : > { %1178 = vtanh.f32 %v445_v56 }
  0xfe   : > { %v362_v58 = vpop.f32.mrb[2].mxu0 }
  0xff   : > { %v1036_v59 = vmul.f32 -1.442695, %v362_v58  ;;  %v451_v60 = vpop.f32.mrb[2].mxu1  ;;  %v364_v61 = vpop.f32.mrb[3].mxu0 }
 0x100   : > { %v1038_v62 = vmul.f32 -1.442695, %v451_v60  ;;  %v1037_v63 = vmul.f32 -1.442695, %v364_v61  ;;  %v453_v1 = vpop.f32.mrb[3].mxu1 }
 0x101   : > { %1180 = vpow2.f32 %v1036_v59  ;;  %v1039_v2 = vmul.f32 -1.442695, %v453_v1 }
 0x102   : > { %1182 = vpow2.f32 %v1038_v62  ;;  %v368_v0 = vpop.f32.mrb[4].mxu0 }
 0x103   : > { %1184 = vpow2.f32 %v1037_v63  ;;  %v1043_v3 = vmul.f32 -1.442695, %v368_v0  ;;  %v457_v4 = vpop.f32.mrb[4].mxu1  ;;  %v370_v5 = vpop.f32.mrb[5].mxu0 }
 0x104   : > { %1186 = vpow2.f32 %v1039_v2  ;;  %v1045_v6 = vmul.f32 -1.442695, %v457_v4  ;;  %v1044_v7 = vmul.f32 -1.442695, %v370_v5  ;;  %v459_v8 = vpop.f32.mrb[5].mxu1  ;;  %v782_v2 = vld [vmem:[%s1538_s23] sm:$0xff] }
 0x105   : > { %1188 = vpow2.f32 %v1043_v3  ;;  %v1046_v9 = vmul.f32 -1.442695, %v459_v8  ;;  %v1520_v14 = vpop.eup %1174  ;;  %v784_v4 = vld [vmem:[%s1538_s23 + $0x10] sm:$0xff]  ;;  %v783_v8 = vld [vmem:[%s1538_s23 + $0x8] sm:$0xff] }
 0x106   : > { %1190 = vpow2.f32 %v1045_v6  ;;  %v374_v10 = vpop.f32.mrb[6].mxu0  ;;  %v1522_v18 = vpop.eup %1176 }
 0x107   : > { %1192 = vpow2.f32 %v1044_v7  ;;  %v1050_v11 = vmul.f32 -1.442695, %v374_v10  ;;  %v376_v12 = vpop.f32.mrb[7].mxu0  ;;  %v463_v13 = vpop.f32.mrb[6].mxu1 }
 0x108   : > { %1194 = vpow2.f32 %v1046_v9  ;;  %v1051_v15 = vmul.f32 -1.442695, %v376_v12  ;;  %v1052_v16 = vmul.f32 -1.442695, %v463_v13  ;;  %v465_v17 = vpop.f32.mrb[7].mxu1  ;;  %v1179_v20 = vpop.eup %1178  ;;  %v785_v12 = vld [vmem:[%s1538_s23 + $0x18] sm:$0xff] }
 0x109   : > { %1196 = vpow2.f32 %v1050_v11  ;;  %v1053_v19 = vmul.f32 -1.442695, %v465_v17 }
 0x10a   : > { %1198 = vpow2.f32 %v1051_v15  ;;  %v1524_v21 = vpop.f32.mrb[8].mxu0 }
 0x10b   : > { %v1181_v22 = vpop.eup %1180  ;;  %1200 = vpow2.f32 %v1052_v16  ;;  %v1088_v23 = vpop.f32.mrb[8].mxu1 }
 0x10c   : > { %v1526_v24 = vpop.f32.mrb[9].mxu0  ;;  %v1183_v25 = vpop.eup %1182  ;;  %v670_v26 = vadd.f32 1.0, %v1181_v22  ;;  %1202 = vpow2.f32 %v1053_v19  ;;  %v1042_v53 = vmul.f32 -1.442695, %v1088_v23 }
 0x10d   : > { %v1528_v27 = vpop.f32.mrb[9].mxu1  ;;  %v1185_v28 = vpop.eup %1184  ;;  %1204 = vtanh.f32 %v447_v57  ;;  %v672_v29 = vadd.f32 1.0, %v1183_v25 }
 0x10e   : > { %v1187_v30 = vpop.eup %1186  ;;  %1206 = vrcp.f32 %v670_v26  ;;  %v671_v31 = vadd.f32 1.0, %v1185_v28  ;;  %v540_v32 = vpop.f32.mrb[10].mxu0 }
 0x10f   : > { %v1189_v33 = vpop.eup %1188  ;;  %1208 = vrcp.f32 %v672_v29  ;;  %v673_v34 = vadd.f32 1.0, %v1187_v30  ;;  %v1530_v35 = vpop.f32.mrb[10].mxu1  ;;  %v1040_v62 = vmul.f32 -1.442695, %v540_v32 }
 0x110   : > { %v542_v36 = vpop.f32.mrb[11].mxu0  ;;  %v1191_v37 = vpop.eup %1190  ;;  %1210 = vrcp.f32 %v671_v31  ;;  %v712_v38 = vadd.f32 1.0, %v1189_v33  ;;  %v1056_v31 = vmul.f32 -1.442695, %v1530_v35 }
 0x111   : > { %v633_v39 = vpop.f32.mrb[11].mxu1  ;;  %v1193_v40 = vpop.eup %1192  ;;  %1212 = vrcp.f32 %v673_v34  ;;  %v714_v41 = vadd.f32 1.0, %v1191_v37  ;;  %v1041_v5 = vmul.f32 -1.442695, %v542_v36 }
 0x112   : > { %v1195_v42 = vpop.eup %1194  ;;  %1214 = vrcp.f32 %v712_v38  ;;  %v713_v43 = vadd.f32 1.0, %v1193_v40  ;;  %v546_v44 = vpop.f32.mrb[12].mxu0  ;;  %v1049_v9 = vmul.f32 -1.442695, %v633_v39 }
 0x113   : > { %v1197_v45 = vpop.eup %1196  ;;  %1216 = vrcp.f32 %v714_v41  ;;  %v715_v46 = vadd.f32 1.0, %v1195_v42  ;;  %v548_v47 = vpop.f32.mrb[13].mxu0  ;;  %v1047_v22 = vmul.f32 -1.442695, %v546_v44 }
 0x114   : > { %v1199_v48 = vpop.eup %1198  ;;  %1218 = vrcp.f32 %v713_v43  ;;  %v754_v49 = vadd.f32 1.0, %v1197_v45  ;;  %v1048_v26 = vmul.f32 -1.442695, %v548_v47 }
 0x115   : > { %v1201_v50 = vpop.eup %1200  ;;  %1220 = vrcp.f32 %v715_v46  ;;  %v755_v51 = vadd.f32 1.0, %v1199_v48 }
 0x116   : > { %v1203_v52 = vpop.eup %1202  ;;  %v1533_v54 = vpop.f32.mrb[14].mxu0  ;;  %v756_v56 = vadd.f32 1.0, %v1201_v50  ;;  %1222 = vrcp.f32 %v754_v49 }
 0x117   : > { %v1205_v55 = vpop.eup %1204  ;;  %v1540_v57 = vpop.f32.mrb[15].mxu0  ;;  %v757_v59 = vadd.f32 1.0, %v1203_v52  ;;  %1224 = vrcp.f32 %v755_v51  ;;  %v1054_v40 = vmul.f32 -1.442695, %v1533_v54 }
 0x118   : > { %v1207_v58 = vpop.eup %1206  ;;  %1226 = vpow2.f32 %v1042_v53  ;;  %v1055_v42 = vmul.f32 -1.442695, %v1540_v57 }
 0x119   : > { %v1209_v60 = vpop.eup %1208  ;;  %v775_v61 = vmul.f32 %v1207_v58, %v1520_v14  ;;  %1228 = vrcp.f32 %v756_v56 }
 0x11a   : > { %v1211_v63 = vpop.eup %1210  ;;  %v777_v1 = vmul.f32 %v1209_v60, %v1179_v20  ;;  %1230 = vrcp.f32 %v757_v59  ;;  %v788_v59 = vld [vmem:[%s1538_s23 + $0x30] sm:$0xff] }
 0x11b   : > { %v1213_v0 = vpop.eup %1212  ;;  %v776_v3 = vmul.f32 %v1211_v63, %v1522_v18  ;;  %1232 = vpow2.f32 %v1040_v62 }
 0x11c   : > { %v1215_v6 = vpop.eup %1214  ;;  %v778_v7 = vmul.f32 %v1213_v0, %v1205_v55  ;;  %1234 = vtanh.f32 %v1528_v27 }
 0x11d   : > { %v1217_v10 = vpop.eup %1216  ;;  %v789_v11 = vmul.f32 %v1215_v6, %v782_v2  ;;  %1236 = vpow2.f32 %v1041_v5  ;;  %v787_v5 = vld [vmem:[%s1538_s23 + $0x28] sm:$0xff] }
 0x11e   : > { %v1219_v13 = vpop.eup %1218  ;;  %v791_v14 = vmul.f32 %v1217_v10, %v784_v4  ;;  %1238 = vpow2.f32 %v1049_v9  ;;  %v786_v4 = vld [vmem:[%s1538_s23 + $0x20] sm:$0xff]  ;;  %s1294_s23 = scalar_lea.vmem %s1293_s22, 1792 }
 0x11f   : > { %v1221_v15 = vpop.eup %1220  ;;  %v796_v16 = vadd.f32 %v789_v11, %v775_v61  ;;  %v790_v17 = vmul.f32 %v1219_v13, %v783_v8 }
 0x120   : > { %v798_v18 = vadd.f32 %v791_v14, %v777_v1  ;;  %v792_v19 = vmul.f32 %v1221_v15, %v785_v12  ;;  %v1223_v23 = vpop.eup %1222 }
 0x121   : > { %1240 = vtanh.f32 %v796_v16  ;;  %v797_v20 = vadd.f32 %v790_v17, %v776_v3  ;;  %v1225_v28 = vpop.eup %1224 }
 0x122   : > { %1242 = vtanh.f32 %v798_v18  ;;  %v799_v25 = vadd.f32 %v792_v19, %v778_v7  ;;  %v1227_v29 = vpop.eup %1226 }
 0x123   : > { %1244 = vtanh.f32 %v797_v20  ;;  %v1229_v30 = vpop.eup %1228  ;;  %v676_v27 = vadd.f32 1.0, %v1227_v29 }
 0x124   : > { %1246 = vtanh.f32 %v799_v25  ;;  %v1231_v32 = vpop.eup %1230 }
 0x125   : > { %1248 = vpow2.f32 %v1047_v22  ;;  %v1233_v33 = vpop.eup %1232 }
 0x126   : > { %1250 = vpow2.f32 %v1048_v26  ;;  %v1235_v34 = vpop.eup %1234  ;;  %v674_v36 = vadd.f32 1.0, %v1233_v33 }
 0x127   : > { %1252 = vrcp.f32 %v676_v27  ;;  %v1237_v37 = vpop.eup %1236 }
 0x128   : > { %1254 = vtanh.f32 %v1524_v21  ;;  %v1239_v38 = vpop.eup %1238  ;;  %v675_v39 = vadd.f32 1.0, %v1237_v37 }
 0x129   : > { %1256 = vpow2.f32 %v1056_v31  ;;  %v718_v35 = vadd.f32 1.0, %v1239_v38 }
 0x12a   : > { %1258 = vrcp.f32 %v674_v36 }
 0x12b   : > { %v1241_v41 = vpop.eup %1240  ;;  %1260 = vtanh.f32 %v1526_v24 }
 0x12c   : > { %v1243_v43 = vpop.eup %1242  ;;  %1262 = vrcp.f32 %v675_v39  ;;  %v1554_v44 = vmul.f32 %v1241_v41, %v1223_v23 }
 0x12d   : > { %v1245_v45 = vpop.eup %1244  ;;  %1264 = vrcp.f32 %v718_v35  ;;  %v1556_v21 = vmul.f32 %v1243_v43, %v1229_v30 }
 0x12e   : > { %v1247_v46 = vpop.eup %1246  ;;  %1266 = vpow2.f32 %v1054_v40  ;;  %v1558_v47 = vmul.f32 %v1245_v45, %v1225_v28  ;;  %v834_v14 = vmul.f32 %v1554_v44, %v1554_v44 }
 0x12f   : > { %v1249_v48 = vpop.eup %1248  ;;  %1268 = vpow2.f32 %v1055_v42  ;;  %v1560_v49 = vmul.f32 %v1247_v46, %v1231_v32  ;;  %v836_v23 = vmul.f32 %v1556_v21, %v1556_v21 }
 0x130   : > { %v1251_v24 = vpop.eup %1250  ;;  %v716_v50 = vadd.f32 1.0, %v1249_v48  ;;  %v835_v15 = vmul.f32 %v1558_v47, %v1558_v47  ;;  %v817_v16 = vadd.f32 %v1558_v47, %v1554_v44 }
 0x131   : > { %v1253_v51 = vpop.eup %1252  ;;  %v717_v52 = vadd.f32 1.0, %v1251_v24  ;;  %v837_v32 = vmul.f32 %v1560_v49, %v1560_v49 }
 0x132   : > { %v1255_v53 = vpop.eup %1254  ;;  %v781_v54 = vmul.f32 %v1253_v51, %v1235_v34  ;;  %1270 = vrcp.f32 %v716_v50  ;;  %v841_v19 = vadd.f32 %v835_v15, %v834_v14  ;;  %v818_v22 = vadd.f32 %v817_v16, %v1556_v21  ;;  %v890_v14 = vld [vmem:[%s1701_s3 + $0x28] sm:$0xff]  ;;  %v891_v15 = vld [vmem:[%s1701_s3 + $0x30] sm:$0xff]  ;;  %v1057_v16 = vld [vmem:[%s1701_s3 + $0x38] sm:$0xff] }
 0x133   : > { %v1257_v55 = vpop.eup %1256  ;;  %1272 = vrcp.f32 %v717_v52 }
 0x134   : > { %v1259_v56 = vpop.eup %1258  ;;  %v760_v62 = vadd.f32 1.0, %v1257_v55  ;;  %v842_v28 = vadd.f32 %v841_v19, %v836_v23  ;;  %v819_v31 = vadd.f32 %v818_v22, %v1560_v49  ;;  %v1059_v22 = vld [vmem:[%s1701_s3 + $0x48] sm:$0xff]  ;;  %v1060_v23 = vld [vmem:[%s1701_s3 + $0x50] sm:$0xff] }
 0x135   : > { %v1261_v57 = vpop.eup %1260  ;;  %v779_v58 = vmul.f32 %v1259_v56, %v1255_v53 }
 0x136   : > { %v1263_v60 = vpop.eup %1262  ;;  %1274 = vrcp.f32 %v760_v62  ;;  %v843_v37 = vadd.f32 %v842_v28, %v837_v32 }
 0x137   : > { %v1265_v61 = vpop.eup %1264  ;;  %v780_v63 = vmul.f32 %v1263_v60, %v1261_v57 }
 0x138   : > { %v1267_v1 = vpop.eup %1266  ;;  %v795_v2 = vmul.f32 %v1265_v61, %v788_v59 }
 0x139   : > { %v1269_v0 = vpop.eup %1268  ;;  %v758_v6 = vadd.f32 1.0, %v1267_v1 }
 0x13a   : > { %v802_v3 = vadd.f32 %v795_v2, %v781_v54  ;;  %v759_v8 = vadd.f32 1.0, %v1269_v0 }
 0x13c   : > { %v1271_v7 = vpop.eup %1270  ;;  %1276 = vtanh.f32 %v802_v3 }
 0x13d   : > { %v1273_v9 = vpop.eup %1272  ;;  %v793_v10 = vmul.f32 %v1271_v7, %v786_v4  ;;  %1278 = vrcp.f32 %v758_v6  ;;  %v886_v6 = vld [vmem:[%s1701_s3 + $0x8] sm:$0xff] }
 0x13e   : > { %v794_v11 = vmul.f32 %v1273_v9, %v787_v5  ;;  %1280 = vrcp.f32 %v759_v8  ;;  %v885_v5 = vld [vmem:[%s1701_s3] sm:$0xff] }
 0x13f   : > { %v800_v12 = vadd.f32 %v793_v10, %v779_v58  ;;  %v889_v9 = vld [vmem:[%s1701_s3 + $0x20] sm:$0xff] }
 0x140   : > { %v801_v13 = vadd.f32 %v794_v11, %v780_v63  ;;  %v1275_v17 = vpop.eup %1274 }
 0x141   : > { %1282 = vtanh.f32 %v800_v12 }
 0x142   : > { %1284 = vtanh.f32 %v801_v13 }
 0x146   : > { %v1277_v18 = vpop.eup %1276 }
 0x147   : > { %v1571_v20 = vmul.f32 %v1277_v18, %v1275_v17  ;;  %v1279_v25 = vpop.eup %1278 }
 0x148   : > { %v1281_v26 = vpop.eup %1280 }
 0x149   : > { %v823_v41 = vsel %vm822_vm2, %v1571_v20, 0.0  ;;  %v840_v35 = vmul.f32 %v1571_v20, %v1571_v20 }
 0x14b   : > { %v1283_v29 = vpop.eup %1282  ;;  %v846_v45 = vsel %vm822_vm2, %v840_v35, 0.0 }
 0x14c   : > { %v1285_v30 = vpop.eup %1284  ;;  %v1576_v27 = vmul.f32 %v1283_v29, %v1279_v25 }
 0x14d   : > { %v1581_v33 = vmul.f32 %v1285_v30, %v1281_v26  ;;  %v1061_v30 = vld [vmem:[%s1701_s3 + $0x58] sm:$0xff] }
 0x14e   : > { %v820_v34 = vadd.f32 %v819_v31, %v1576_v27  ;;  %v838_v36 = vmul.f32 %v1576_v27, %v1576_v27  ;;  %v1063_v31 = vld [vmem:[%s1701_s3 + $0x68] sm:$0xff] }
 0x14f   : > { %v839_v38 = vmul.f32 %v1581_v33, %v1581_v33 }
 0x150   : > { %v821_v39 = vadd.f32 %v820_v34, %v1581_v33  ;;  %v844_v40 = vadd.f32 %v843_v37, %v838_v36 }
 0x152   : > { %v824_v42 = vadd.f32 %v823_v41, %v821_v39  ;;  %v845_v43 = vadd.f32 %v844_v40, %v839_v38 }
 0x154   : > { %825 = vadd.xlane.f32.xlu0 %v824_v42  ;;  %v847_v46 = vadd.f32 %v846_v45, %v845_v43 }
 0x158   : > { %848 = vadd.xlane.f32.xlu0 %v847_v46 }
 0x1e1   : > { %v826_v48 = vpop.xlane.xlu0 %825 }
 0x1e2   : > { %v827_v24 = vrot.slane %v826_v48, 4 }
 0x1e4   : > { %v828_v50 = vadd.f32 %v827_v24, %v826_v48 }
 0x1e5   : > { %v849_v51 = vpop.xlane.xlu0 %848 }
 0x1e6   : > { %v829_v52 = vrot.slane %v828_v50, 2  ;;  %v850_v53 = vrot.slane %v849_v51, 4 }
 0x1e8   : > { %v851_v54 = vadd.f32 %v850_v53, %v849_v51  ;;  %v830_v55 = vadd.f32 %v829_v52, %v828_v50 }
 0x1ea   : > { %v852_v56 = vrot.slane %v851_v54, 2  ;;  %v831_v57 = vrot.slane %v830_v55, 1 }
 0x1ec   : > { %v853_v58 = vadd.f32 %v852_v56, %v851_v54  ;;  %v832_v59 = vadd.f32 %v831_v57, %v830_v55 }
 0x1ee   : > { %1127 = vpush %v832_v59  ;;  %v854_v60 = vrot.slane %v853_v58, 1 }
 0x1f0   : > { %v855_v61 = vadd.f32 %v854_v60, %v853_v58 }
 0x1f2   : > { %1129 = vpush %v855_v61 }
 0x21f   : > { %s1128_s27 = spop %1127 }
 0x220   : > { %s859_s28 = smul.f32 0.00015943877, %s1128_s27 }
 0x221   : > { %s1133_s27 = smul.u32 896, %s1400_s19 }
 0x222   : > { %s863_s29 = smul.f32 %s859_s28, %s859_s28  ;;  %v865_v1 = vstv %s859_s28 }
 0x223   : > { %s1130_s30 = spop %1129  ;;  %v866_v2 = vsub.f32 %v1554_v44, %v865_v1  ;;  %v867_v0 = vsub.f32 %v1558_v47, %v865_v1  ;;  %v868_v3 = vsub.f32 %v1556_v21, %v865_v1  ;;  %v869_v4 = vsub.f32 %v1560_v49, %v865_v1  ;;  %v887_v21 = vld [vmem:[%s1701_s3 + $0x10] sm:$0xff]  ;;  %v888_v49 = vld [vmem:[%s1701_s3 + $0x18] sm:$0xff]  ;;  %s1653_s13 = scalar_lea.hbm %s1702_s4, %s1133_s27 }
 0x224   : > { %s862_s5 = smul.f32 0.00015943877, %s1130_s30  ;;  %v870_v7 = vsub.f32 %v1576_v27, %v865_v1  ;;  %v871_v8 = vsub.f32 %v1581_v33, %v865_v1  ;;  %v872_v44 = vsub.f32 %v1571_v20, %v865_v1  ;;  %v1058_v20 = vld [vmem:[%s1701_s3 + $0x40] sm:$0xff] }
 0x225   : > { %v1062_v27 = vld [vmem:[%s1701_s3 + $0x60] sm:$0xff] }
 0x226   : > { %s864_s6 = ssub.f32 %s862_s5, %s863_s29 }
 0x228   : > { %s873_s7 = sadd.f32 1e-05, %s864_s6 }
 0x22a   : > { %v874_v62 = vstv %s873_s7 }
 0x22b   : > { %1286 = vrsqrt.f32 %v874_v62 }
 0x235   : > { %v1287_v63 = vpop.eup %1286 }
 0x236   : > { %1131 = vpush %v1287_v63 }
 0x267   : > { %s1132_s10 = spop %1131 }
 0x268   : > { %v877_v47 = vstv %s1132_s10  ;;  %s205_s10 = scalar_lea.vmem [#allocation2], %s1597_s9  ;;  %s922_s9 = scalar_lea.sflag [#allocation3], %s203_s8 }
 0x269   : > { %v878_v10 = vmul.f32 %v877_v47, %v866_v2  ;;  %v879_v11 = vmul.f32 %v877_v47, %v867_v0  ;;  %v880_v12 = vmul.f32 %v877_v47, %v868_v3  ;;  %v881_v13 = vmul.f32 %v877_v47, %v869_v4  ;;  %s936_s11 = sshll.u32 %s205_s10, 4  ;;  %s1655_s11 = int_to_ptr.vmem [resolvable:$true] %s936_s11 }
 0x26a   : > { %v882_v17 = vmul.f32 %v877_v47, %v870_v7  ;;  %v883_v18 = vmul.f32 %v877_v47, %v871_v8  ;;  %v884_v19 = vmul.f32 %v877_v47, %v872_v44  ;;  %s1288_s14 = scalar_lea.vmem %s1655_s11, 896  ;;  %p1295_p0 = scmp.lt.s32.totalorder %s1655_s11, %s1293_s22 }
 0x26b   : > { %v892_v25 = vmul.f32 %v885_v5, %v878_v10  ;;  %v893_v26 = vmul.f32 %v886_v6, %v879_v11  ;;  %v894_v28 = vmul.f32 %v887_v21, %v880_v12  ;;  %v895_v29 = vmul.f32 %v888_v49, %v881_v13  ;;  %p1289_p11 = scmp.ne.s32.totalorder %s1655_s11, %s1288_s14  ;;  %p1296_p1 = scmp.lt.s32.totalorder %s1294_s23, %s1288_s14 }
 0x26c   : > { %v896_v32 = vmul.f32 %v889_v9, %v882_v17  ;;  %v897_v33 = vmul.f32 %v890_v14, %v883_v18  ;;  %v898_v34 = vmul.f32 %v891_v15, %v884_v19 }
 0x26d   : > { %v907_v36 = vadd.f32 %v1057_v16, %v892_v25  ;;  %v908_v37 = vadd.f32 %v1058_v20, %v893_v26  ;;  %v909_v38 = vadd.f32 %v1059_v22, %v894_v28  ;;  %v910_v39 = vadd.f32 %v1060_v23, %v895_v29  ;;  %p1290_p12 = pnand %p1289_p11, %p1417_p5  ;;  %p1297_p2 = por %p1296_p1, %p1295_p0 }
 0x26e   : > { %v911_v40 = vadd.f32 %v1061_v30, %v896_v32  ;;  %v912_v41 = vadd.f32 %v1062_v27, %v897_v33  ;;  %v913_v35 = vadd.f32 %v1063_v31, %v898_v34 }
 0x26f   : > { %914 = vst [vmem:[%s205_s10] sm:$0xff] %v907_v36  ;;  %915 = vst [vmem:[%s205_s10 + $0x8] sm:$0xff] %v908_v37  ;;  %p1291_p13 = pneg %p1290_p12 }
 0x270   : > { %916 = vst [vmem:[%s205_s10 + $0x10] sm:$0xff] %v909_v38  ;;  %917 = vst [vmem:[%s205_s10 + $0x18] sm:$0xff] %v910_v39 }
 0x271   : > { %918 = vst [vmem:[%s205_s10 + $0x20] sm:$0xff] %v911_v40  ;;  %919 = vst [vmem:[%s205_s10 + $0x28] sm:$0xff] %v912_v41  ;;  %p1298_p3 = pnand %p1297_p2, %p1291_p13 }
 0x272   : > { %920 = vst.msk [vmem:[%s205_s10 + $0x30] sm:$0xff] %vm822_vm2, %v913_v35 }
 0x273   : > { %1301 = shalt.err (!%p1298_p3)
}
 0x274   : > { %s1302_s8 = scalar_lea.hbm %s1653_s13, 896  ;;  %s1306_s29 = scalar_lea.hbm %s1702_s4, 1792 }
 0x275   : > { %p1303_p4 = scmp.ne.s32.totalorder %s1653_s13, %s1302_s8  ;;  %p1307_p9 = scmp.lt.u32.totalorder %s1653_s13, %s1702_s4 }
 0x276   : > { %p1308_p10 = scmp.lt.u32.totalorder %s1306_s29, %s1302_s8  ;;  %p1310_p12 = scmp.lt.u32.totalorder %s1302_s8, %s1653_s13 }
 0x277   : > { %p1304_p7 = pnand %p1303_p4, %p1417_p5 }
 0x278   : > { %p1309_p11 = por %p1308_p10, %p1307_p9 }
 0x279   : > { %p1305_p8 = pneg %p1304_p7 }
 0x27a   : > { %p1311_p13 = por %p1310_p12, %p1309_p11 }
 0x27c   : > { %p1312_p0 = pnand %p1311_p13, %p1305_p8 }
 0x27e   : > { %1315 = shalt.err (!%p1312_p0)
}
 0x27f   : > { %1134 = dma.vmem_to_hbm [thread:$0]  (%p1417_p5), %s1655_s11, 896, %s1653_s13, %s922_s9  }
 0x280 PF: > { %p1140_p1 = scmp.ge.s32.totalorder %s1350_s18, 2  ;;  %s948_s6 = sand.u32 1, %s1338_s15  }
 0x281   : > { %s949_s7 = scalar_lea.sflag [#allocation3], %s948_s6 }
 0x282   : > { %p1137_p2 = pnand %p1140_p1, %p1421_p6 }
 0x284   : > { %1333 = dma.done.wait (!%p1137_p2), %s949_s7, 896  }
 0x285   : > { %1335 = vsyncadd (!%p1137_p2), %s949_s7, 4294966400  ;;  %p14_p3 = scmp.ge.s32.totalorder %s1404_s21, 4   ;;  %s1705_s15 = smov %s1342_s16 }
 0x286   : > { %s1706_s16 = smov %s1346_s17  ;;  %s1707_s17 = smov %s1415_s24 }
 0x287   : > { %s1708_s18 = smov %s1404_s21  ;;  %16 = sbr.rel (!%p14_p3) target bundleno = 3 (0x3), region = 75 }
 0x28e   :  { %954 = vsyncpa [#allocation3], 1 }
 0x28f   :  { %956 = vsyncpa [#allocation3 + $0x1], 1 }

</bundles_post_ra>
